<compile_context>
chip_gen: v7x
topology: tpu7x:2x2x1
jax: 0.10.0
libtpu: 0.0.40
codegen_flags: <defaults>
</compile_context>

<pallas_src>
import functools
import math

import jax
import jax.numpy as jnp
from jax import lax
from jax.experimental import pallas as pl
from jax.experimental.pallas import tpu as pltpu


_VMEM_LIMIT = None


def _vmem_limit():
    """3/4 of physical VMEM, capped at 96 MiB (v5e/v6e ~96 MiB, v7x 48 MiB)."""
    global _VMEM_LIMIT
    if _VMEM_LIMIT is None:
        try:
            cap = pltpu.get_tpu_info().vmem_capacity_bytes
            _VMEM_LIMIT = int(min(96 * 1024 * 1024, cap * 3 // 4))
        except Exception:
            _VMEM_LIMIT = 48 * 1024 * 1024
    return _VMEM_LIMIT


def _pick_tile(dim, target):
    """Largest tile <= target that divides dim (full dim if small/awkward)."""
    if dim <= target:
        return dim
    t = target
    while dim % t != 0:
        t //= 2
        if t < 8:
            return dim  # TODO(synk): pad-and-mask path for prime-ish dims
    return t


# ----------------------------- Pallas kernels ------------------------------

def _matmul_kernel(x_ref, w_ref, b_ref, o_ref, acc_ref, *, activation):
    """Tiled y = x @ w + b (optional ReLU). K is the last (reduction) grid axis."""
    @pl.when(pl.program_id(2) == 0)
    def _init():
        acc_ref[...] = jnp.zeros_like(acc_ref)

    # bf16 operands on the MXU, fp32 accumulation.
    acc_ref[...] += jnp.dot(x_ref[...], w_ref[...],
                            preferred_element_type=jnp.float32)

    @pl.when(pl.program_id(2) == pl.num_programs(2) - 1)
    def _finalize():
        y = acc_ref[...] + b_ref[...]
        if activation == "relu":
            y = jnp.maximum(y, 0.0)
        o_ref[...] = y.astype(o_ref.dtype)


def _matmul_add_ln_kernel(x_ref, w_ref, b_ref, res_ref, g_ref, bln_ref,
                          o_ref, acc_ref, *, eps):
    """y = LayerNorm(res + x @ w + b); LN fused into the matmul epilogue.
    Output tile spans the full feature dim so the LN reduction is local."""
    @pl.when(pl.program_id(1) == 0)
    def _init():
        acc_ref[...] = jnp.zeros_like(acc_ref)

    acc_ref[...] += jnp.dot(x_ref[...], w_ref[...],
                            preferred_element_type=jnp.float32)

    @pl.when(pl.program_id(1) == pl.num_programs(1) - 1)
    def _finalize():
        # Residual add + LN statistics in fp32 (residual arrives bf16 at rest).
        z = res_ref[...].astype(jnp.float32) + acc_ref[...] + b_ref[...]
        mean = jnp.mean(z, axis=-1, keepdims=True)
        var = jnp.mean(jnp.square(z - mean), axis=-1, keepdims=True)
        y = (z - mean) * lax.rsqrt(var + eps) * g_ref[...] + bln_ref[...]
        o_ref[...] = y.astype(o_ref.dtype)


def _attn_kernel(q_ref, k_ref, v_ref, o_ref, *p_refs, scale):
    """Softmax attention for one (batch, head, query-block).
    Blocks: q (tq, dh), k/v (L, dh) -> scores (tq, L) (VMEM linear in L)."""
    # Contract both last dims: MXU consumes K directly, no XLU transpose that
    # would otherwise be redone once per query block.
    s = lax.dot_general(q_ref[...], k_ref[...],
                        dimension_numbers=(((1,), (1,)), ((), ())),
                        preferred_element_type=jnp.float32) * scale   # (tq, L)
    m = jnp.max(s, axis=-1, keepdims=True)
    e = jnp.exp(s - m)
    p = e / jnp.sum(e, axis=-1, keepdims=True)     # exact softmax (returned maps)
    o = jnp.dot(p.astype(v_ref.dtype), v_ref[...],
                preferred_element_type=jnp.float32)                    # (tq, dh)
    o_ref[...] = o.astype(o_ref.dtype)
    if p_refs:
        p_refs[0][...] = p.astype(p_refs[0].dtype)


def _layernorm_kernel(x_ref, g_ref, b_ref, o_ref, *, eps):
    x = x_ref[...].astype(jnp.float32)
    mean = jnp.mean(x, axis=-1, keepdims=True)
    var = jnp.mean(jnp.square(x - mean), axis=-1, keepdims=True)
    o_ref[...] = ((x - mean) * lax.rsqrt(var + eps) * g_ref[...]
                  + b_ref[...]).astype(o_ref.dtype)


# ----------------------------- Kernel wrappers ------------------------------

def linear(x2d, w_bf16, b, activation=None, out_dtype=jnp.bfloat16):
    """Tiled (M,K)@(K,N)+b: bf16 MXU operands, fp32 accumulation, bf16 output."""
    M, K = x2d.shape
    N = w_bf16.shape[1]
    tm = _pick_tile(M, 512)
    tn = _pick_tile(N, 256)
    tk = _pick_tile(K, 1024)
    grid = (M // tm, N // tn, K // tk)

    cost = pl.CostEstimate(
        flops=2 * M * N * K, transcendentals=0,
        bytes_accessed=(M * K * x2d.dtype.itemsize
                        + K * N * w_bf16.dtype.itemsize
                        + M * N * jnp.dtype(out_dtype).itemsize + N * 4))

    return pl.pallas_call(
        functools.partial(_matmul_kernel, activation=activation),
        out_shape=jax.ShapeDtypeStruct((M, N), out_dtype),
        grid=grid,
        in_specs=[
            pl.BlockSpec((tm, tk), lambda i, j, k: (i, k)),
            pl.BlockSpec((tk, tn), lambda i, j, k: (k, j)),
            pl.BlockSpec((1, tn), lambda i, j, k: (0, j)),
        ],
        out_specs=pl.BlockSpec((tm, tn), lambda i, j, k: (i, j)),
        scratch_shapes=[pltpu.VMEM((tm, tn), jnp.float32)],
        compiler_params=pltpu.CompilerParams(
            dimension_semantics=("parallel", "parallel", "arbitrary"),
            vmem_limit_bytes=_vmem_limit()),
        cost_estimate=cost,
    )(x2d, w_bf16, b.reshape(1, N))


def linear_add_layernorm(x2d, w_bf16, b, res2d, gamma, beta, eps=1e-5,
                         out_dtype=jnp.bfloat16):
    """LayerNorm(res + x @ w + b) with the LN fused into the matmul epilogue."""
    M, K = x2d.shape
    N = w_bf16.shape[1]
    tm = _pick_tile(M, 256)     # acc is (tm, N) fp32: keep tm moderate
    tk = _pick_tile(K, 1024)
    grid = (M // tm, K // tk)

    cost = pl.CostEstimate(
        flops=2 * M * N * K + 8 * M * N, transcendentals=M,
        bytes_accessed=(M * K * x2d.dtype.itemsize
                        + K * N * w_bf16.dtype.itemsize
                        + M * N * res2d.dtype.itemsize
                        + M * N * jnp.dtype(out_dtype).itemsize + 3 * N * 4))

    return pl.pallas_call(
        functools.partial(_matmul_add_ln_kernel, eps=eps),
        out_shape=jax.ShapeDtypeStruct((M, N), out_dtype),
        grid=grid,
        in_specs=[
            pl.BlockSpec((tm, tk), lambda i, k: (i, k)),
            pl.BlockSpec((tk, N), lambda i, k: (k, 0)),
            pl.BlockSpec((1, N), lambda i, k: (0, 0)),
            pl.BlockSpec((tm, N), lambda i, k: (i, 0)),   # residual (bf16)
            pl.BlockSpec((1, N), lambda i, k: (0, 0)),    # gamma
            pl.BlockSpec((1, N), lambda i, k: (0, 0)),    # beta
        ],
        out_specs=pl.BlockSpec((tm, N), lambda i, k: (i, 0)),
        scratch_shapes=[pltpu.VMEM((tm, N), jnp.float32)],
        compiler_params=pltpu.CompilerParams(
            dimension_semantics=("parallel", "arbitrary"),
            vmem_limit_bytes=_vmem_limit()),
        cost_estimate=cost,
    )(x2d, w_bf16, b.reshape(1, N), res2d, gamma.reshape(1, N), beta.reshape(1, N))


def mha_attention(qkv, n_heads, scale, return_attn=True,
                  attn_dtype=jnp.bfloat16, out_dtype=jnp.bfloat16):
    """qkv: (B, L, 3D) bf16 fused projection output.
    Returns (context (B, L, D), attn (B, H, L, L) or None)."""
    B, L, threeD = qkv.shape
    D = threeD // 3
    H = n_heads
    dh = D // H
    tq = _pick_tile(L, 128)
    grid = (B, H, L // tq)

    lane_aligned = (dh % 128 == 0)
    if lane_aligned:
        # Head slices read directly out of (B, L, 3D) and context written
        # directly into (B, L, D): no XLA transposes / astype round trips.
        inputs = (qkv, qkv, qkv)
        in_specs = [
            pl.BlockSpec((None, tq, dh), lambda b, h, qi: (b, qi, h)),
            pl.BlockSpec((None, L, dh), lambda b, h, qi: (b, 0, H + h)),
            pl.BlockSpec((None, L, dh), lambda b, h, qi: (b, 0, 2 * H + h)),
        ]
        o_shape = jax.ShapeDtypeStruct((B, L, D), out_dtype)
        o_spec = pl.BlockSpec((None, tq, dh), lambda b, h, qi: (b, qi, h))
    else:
        # TODO(synk): sub-128 head dims fall back to an XLA-side head split
        # (pack 2+ heads per grid step to make this path lane-dense too).
        t = qkv.reshape(B, L, 3, H, dh).transpose(2, 0, 3, 1, 4)
        inputs = (t[0], t[1], t[2])
        in_specs = [
            pl.BlockSpec((None, None, tq, dh), lambda b, h, qi: (b, h, qi, 0)),
            pl.BlockSpec((None, None, L, dh), lambda b, h, qi: (b, h, 0, 0)),
            pl.BlockSpec((None, None, L, dh), lambda b, h, qi: (b, h, 0, 0)),
        ]
        o_shape = jax.ShapeDtypeStruct((B, H, L, dh), out_dtype)
        o_spec = pl.BlockSpec((None, None, tq, dh), lambda b, h, qi: (b, h, qi, 0))

    if return_attn:
        out_shape = (o_shape, jax.ShapeDtypeStruct((B, H, L, L), attn_dtype))
        out_specs = (o_spec,
                     pl.BlockSpec((None, None, tq, L),
                                  lambda b, h, qi: (b, h, qi, 0)))
    else:
        out_shape, out_specs = o_shape, o_spec

    cost = pl.CostEstimate(
        flops=4 * B * H * L * L * dh,
        transcendentals=B * H * L * L,
        bytes_accessed=(3 * B * L * D * qkv.dtype.itemsize
                        + B * L * D * jnp.dtype(out_dtype).itemsize
                        + (B * H * L * L * jnp.dtype(attn_dtype).itemsize
                           if return_attn else 0)))

    # TODO(synk): for very long L, switch K/V to a flash-style blocked loop
    # instead of full (L, dh) tiles (matters on v7x's 64 MiB VMEM).
    res = pl.pallas_call(
        functools.partial(_attn_kernel, scale=scale),
        out_shape=out_shape,
        grid=grid,
        in_specs=in_specs,
        out_specs=out_specs,
        compiler_params=pltpu.CompilerParams(
            dimension_semantics=("parallel", "parallel", "parallel"),
            vmem_limit_bytes=_vmem_limit()),
        cost_estimate=cost,
    )(*inputs)

    if return_attn:
        o, attn = res
    else:
        o, attn = res, None
    if not lane_aligned:
        o = o.transpose(0, 2, 1, 3).reshape(B, L, D)
    return o, attn


def layernorm(x2d, gamma, beta, eps=1e-5, out_dtype=jnp.float32):
    M, D = x2d.shape
    tm = _pick_tile(M, 512)
    return pl.pallas_call(
        functools.partial(_layernorm_kernel, eps=eps),
        out_shape=jax.ShapeDtypeStruct((M, D), out_dtype),
        grid=(M // tm,),
        in_specs=[
            pl.BlockSpec((tm, D), lambda i: (i, 0)),
            pl.BlockSpec((1, D), lambda i: (0, 0)),
            pl.BlockSpec((1, D), lambda i: (0, 0)),
        ],
        out_specs=pl.BlockSpec((tm, D), lambda i: (i, 0)),
        compiler_params=pltpu.CompilerParams(
            dimension_semantics=("parallel",),
            vmem_limit_bytes=_vmem_limit()),
    )(x2d, gamma.reshape(1, D), beta.reshape(1, D))


# ----------------------------- Model forward --------------------------------

def encoder_layer_forward(x2d, B, L, p, attn_mask=None, return_attn=True):
    """One attn_layer: MHA + residual+LN + FFN + residual+LN. x2d is (B*L, D) bf16."""
    # TODO(synk): attn_mask is only supported as None (the Encoder default).
    D = x2d.shape[1]
    H = p["n_heads"]
    dh = D // H

    # Fused QKV projection: one matmul against the concatenated (D, 3D) weight.
    qkv = linear(x2d, p["Wqkv"], p["bqkv"])                       # (B*L, 3D) bf16
    o, attn = mha_attention(qkv.reshape(B, L, 3 * D), H,
                            scale=1.0 / math.sqrt(dh), return_attn=return_attn)
    o2d = o.reshape(B * L, D)                                     # free reshape

    # Out-projection with residual + LayerNorm fused into the matmul epilogue.
    x2d = linear_add_layernorm(o2d, p["Wo"], p["bo"], x2d, p["ln1_g"], p["ln1_b"])

    # FFN: bias+ReLU fused into matmul-1; residual+LN fused into matmul-2.
    y = linear(x2d, p["W1"], p["b1"], activation="relu")
    x2d = linear_add_layernorm(y, p["W2"], p["b2"], x2d, p["ln2_g"], p["ln2_b"])
    return x2d, attn


def encoder_forward(x, params, attn_mask=None, return_attn=True):
    """Mirrors Encoder.forward: loop layers, collect attns, optional final norm."""
    B, L, D = x.shape
    x2d = x.reshape(B * L, D).astype(jnp.bfloat16)   # bf16 activations at rest
    attns = []
    for lp in params["layers"]:
        x2d, attn = encoder_layer_forward(x2d, B, L, lp, attn_mask=attn_mask,
                                          return_attn=return_attn)
        attns.append(attn)
    if params.get("norm") is not None:
        x2d = layernorm(x2d, params["norm"]["gamma"], params["norm"]["beta"],
                        out_dtype=jnp.float32)
    return x2d.reshape(B, L, D), attns


# ----------------------------- Parameter init -------------------------------

def init_params(key, n_layers, d_model, n_heads, d_ff):
    layers = []
    for i in range(n_layers):
        k = jax.random.fold_in(key, i)
        ks = jax.random.split(k, 6)
        s = 0.02
        wq = s * jax.random.normal(ks[0], (d_model, d_model), jnp.float32)
        wk = s * jax.random.normal(ks[1], (d_model, d_model), jnp.float32)
        wv = s * jax.random.normal(ks[2], (d_model, d_model), jnp.float32)
        layers.append({
            "n_heads": n_heads,
            # weights stored bf16 (MXU operand dtype); biases / LN params fp32
            "Wqkv": jnp.concatenate([wq, wk, wv], axis=1).astype(jnp.bfloat16),
            "bqkv": jnp.zeros((3 * d_model,), jnp.float32),
            "Wo": (s * jax.random.normal(ks[3], (d_model, d_model),
                                         jnp.float32)).astype(jnp.bfloat16),
            "bo": jnp.zeros((d_model,), jnp.float32),
            "W1": (s * jax.random.normal(ks[4], (d_model, d_ff),
                                         jnp.float32)).astype(jnp.bfloat16),
            "b1": jnp.zeros((d_ff,), jnp.float32),
            "W2": (s * jax.random.normal(ks[5], (d_ff, d_model),
                                         jnp.float32)).astype(jnp.bfloat16),
            "b2": jnp.zeros((d_model,), jnp.float32),
            "ln1_g": jnp.ones((d_model,), jnp.float32),
            "ln1_b": jnp.zeros((d_model,), jnp.float32),
            "ln2_g": jnp.ones((d_model,), jnp.float32),
            "ln2_b": jnp.zeros((d_model,), jnp.float32),
        })
    return {
        "layers": layers,
        "norm": {
            "gamma": jnp.ones((d_model,), jnp.float32),
            "beta": jnp.zeros((d_model,), jnp.float32),
        },
    }


# ----------------------------------- Main ------------------------------------

if __name__ == "__main__":
    # Small shapes, chosen so dh = D / H = 128 is lane-aligned and the fused
    # read-QKV-straight-from-the-projection attention path is exercised.
    B, L, D, H, DFF, N_LAYERS = 2, 16, 256, 2, 512, 2

    key = jax.random.PRNGKey(0)
    k_x, k_p = jax.random.split(key)
    x = jax.random.normal(k_x, (B, L, D), jnp.float32)
    params = init_params(k_p, N_LAYERS, D, H, DFF)

    out, attns = encoder_forward(x, params, attn_mask=None)
    out = jax.block_until_ready(out)
    attns = [jax.block_until_ready(a) for a in attns]

    assert out.shape == (B, L, D)
    assert len(attns) == N_LAYERS
    assert all(a.shape == (B, H, L, L) for a in attns)
    assert bool(jnp.all(jnp.isfinite(out)))
    rowsum = jnp.sum(attns[0].astype(jnp.float32), axis=-1)
    assert bool(jnp.all(jnp.abs(rowsum - 1.0) < 2e-2))   # softmax rows ~ 1
    print("KERNEL_OK")
</pallas_src>

<mosaic_0001>
module attributes {stable_mosaic.version = 11 : i64} {
  func.func @_matmul_kernel(%arg0: i32, %arg1: i32, %arg2: i32, %arg3: memref<32x256xbf16, #tpu.memory_space<vmem>>, %arg4: memref<256x256xbf16, #tpu.memory_space<vmem>>, %arg5: memref<1x256xf32, #tpu.memory_space<vmem>>, %arg6: memref<32x256xbf16, #tpu.memory_space<vmem>>, %arg7: memref<32x256xf32, #tpu.memory_space<vmem>>) attributes {dimension_semantics = [#tpu.dimension_semantics<parallel>, #tpu.dimension_semantics<parallel>, #tpu.dimension_semantics<arbitrary>], iteration_bounds = array<i64: 1, 3, 1>, scalar_prefetch = 0 : i64, scratch_operands = 1 : i64, tpu.core_type = #tpu.core_type<tc>, window_params = [{transform_indices = @transform_0, window_bounds = array<i64: 32, 256>}, {transform_indices = @transform_1, window_bounds = array<i64: 256, 256>}, {transform_indices = @transform_2, window_bounds = array<i64: 1, 256>}, {transform_indices = @transform_3, window_bounds = array<i64: 32, 256>}]} {
    %c0_i32 = arith.constant 0 : i32
    %0 = arith.cmpi eq, %arg2, %c0_i32 : i32
    %1 = arith.extui %0 : i1 to i32
    %c0_i32_0 = arith.constant 0 : i32
    %2 = arith.cmpi ne, %1, %c0_i32_0 : i32
    scf.if %2 {
      %cst_10 = arith.constant 0.000000e+00 : f32
      %12 = vector.broadcast %cst_10 : f32 to vector<32x256xf32>
      %c0_11 = arith.constant 0 : index
      %c0_12 = arith.constant 0 : index
      %13 = vector.load %arg7[%c0_11, %c0_12] : memref<32x256xf32, #tpu.memory_space<vmem>>, vector<32x256xf32>
      tpu.vector_store %arg7[%c0_11, %c0_12], %12 {strides = array<i32>} : memref<32x256xf32, #tpu.memory_space<vmem>>, vector<32x256xf32>,
    } else {
    }
    %c0 = arith.constant 0 : index
    %c0_1 = arith.constant 0 : index
    %3 = vector.load %arg7[%c0, %c0_1] : memref<32x256xf32, #tpu.memory_space<vmem>>, vector<32x256xf32>
    %c0_2 = arith.constant 0 : index
    %c0_3 = arith.constant 0 : index
    %4 = vector.load %arg3[%c0_2, %c0_3] : memref<32x256xbf16, #tpu.memory_space<vmem>>, vector<32x256xbf16>
    %c0_4 = arith.constant 0 : index
    %c0_5 = arith.constant 0 : index
    %5 = vector.load %arg4[%c0_4, %c0_5] : memref<256x256xbf16, #tpu.memory_space<vmem>>, vector<256x256xbf16>
    %cst = arith.constant dense<0.000000e+00> : vector<32x256xf32>
    %6 = tpu.matmul %4, %5, %cst {dimension_numbers = #tpu.dot_dimension_numbers<[1], [0], [0], [1], [0, 0, 1, 1], [], []>} : vector<32x256xbf16>, vector<256x256xbf16>, vector<32x256xf32> -> vector<32x256xf32>
    %7 = arith.addf %3, %6 : vector<32x256xf32>
    %c0_6 = arith.constant 0 : index
    %c0_7 = arith.constant 0 : index
    %8 = vector.load %arg7[%c0_6, %c0_7] : memref<32x256xf32, #tpu.memory_space<vmem>>, vector<32x256xf32>
    tpu.vector_store %arg7[%c0_6, %c0_7], %7 {strides = array<i32>} : memref<32x256xf32, #tpu.memory_space<vmem>>, vector<32x256xf32>,
    %c0_i32_8 = arith.constant 0 : i32
    %9 = arith.cmpi eq, %arg2, %c0_i32_8 : i32
    %10 = arith.extui %9 : i1 to i32
    %c0_i32_9 = arith.constant 0 : i32
    %11 = arith.cmpi ne, %10, %c0_i32_9 : i32
    scf.if %11 {
      %c0_10 = arith.constant 0 : index
      %c0_11 = arith.constant 0 : index
      %12 = vector.load %arg7[%c0_10, %c0_11] : memref<32x256xf32, #tpu.memory_space<vmem>>, vector<32x256xf32>
      %c0_12 = arith.constant 0 : index
      %c0_13 = arith.constant 0 : index
      %13 = vector.load %arg5[%c0_12, %c0_13] : memref<1x256xf32, #tpu.memory_space<vmem>>, vector<1x256xf32>
      %14 = vector.broadcast %13 : vector<1x256xf32> to vector<32x256xf32>
      %15 = arith.addf %12, %14 : vector<32x256xf32>
      %16 = arith.truncf %15 : vector<32x256xf32> to vector<32x256xbf16>
      %c0_14 = arith.constant 0 : index
      %c0_15 = arith.constant 0 : index
      %17 = vector.load %arg6[%c0_14, %c0_15] : memref<32x256xbf16, #tpu.memory_space<vmem>>, vector<32x256xbf16>
      tpu.vector_store %arg6[%c0_14, %c0_15], %16 {strides = array<i32>} : memref<32x256xbf16, #tpu.memory_space<vmem>>, vector<32x256xbf16>,
    } else {
    }
    return
  }
  func.func @transform_0(%arg0: i32, %arg1: i32, %arg2: i32) -> (i32, i32) {
    %c0_i32 = arith.constant 0 : i32
    return %arg0, %arg2 : i32, i32
  }
  func.func @transform_1(%arg0: i32, %arg1: i32, %arg2: i32) -> (i32, i32) {
    %c0_i32 = arith.constant 0 : i32
    return %arg2, %arg1 : i32, i32
  }
  func.func @transform_2(%arg0: i32, %arg1: i32, %arg2: i32) -> (i32, i32) {
    %c0_i32 = arith.constant 0 : i32
    %c0_i32_0 = arith.constant 0 : i32
    return %c0_i32, %arg1 : i32, i32
  }
  func.func @transform_3(%arg0: i32, %arg1: i32, %arg2: i32) -> (i32, i32) {
    %c0_i32 = arith.constant 0 : i32
    return %arg0, %arg1 : i32, i32
  }
}

</mosaic_0001>

<bundles_post_ra>
// kernel: tpu_custom_call.1
= control target key start
LH: loop header
LB: loop body
LE: loop exit
PB: predicated region body
PF: predicated region fallthrough
CT: control target
= control target key end

     0   :  { %8 = vsyncpa [#allocation4], 0  ;;  %s1424_s0 = inlined_call_operand.hbm [shape: bf16[32,256], index: 0, kind: input, shape index: {}]   ;;  %s1425_s1 = inlined_call_operand.hbm [shape: bf16[256,768], index: 1, kind: input, shape index: {}]   ;;  %s1426_s2 = inlined_call_operand.vmem [shape: f32[1,768], index: 2, kind: input, shape index: {}]   ;;  %s1427_s3 = inlined_call_operand.hbm [shape: bf16[32,768], index: 3, kind: output, shape index: {}]  }
   0x1   :  { %9 = vsyncpa [#allocation7], 0 }
   0x2   :  { %11 = vsyncpa [#allocation7 + $0x1], 0 }
   0x3   :  { %12 = vsyncpa [#allocation5], 0 }
   0x4   :  { %14 = vsyncpa [#allocation5 + $0x1], 0  ;;  %s1169_s12 = smov 0   ;;  %s1171_s13 = smov 0  }
   0x5   :  { %s1173_s14 = smov 0   ;;  %s1175_s15 = smov 0  }
   0x6   :  { %s1177_s16 = smov 0   ;;  %s1179_s17 = smov 0  }
   0x7 LB: > { %s765_s18 = sadd.s32 4294967295, %s1138_s17   ;;  %s766_s19 = sadd.s32 4294967294, %s1138_s17   ;;  %s1138_s17 = sphi %s1179_s17, %s20_s17   ;;  %s1134_s16 = sphi %s1177_s16, %s1454_s16   ;;  %s1130_s15 = sphi %s1175_s15, %s1453_s15   ;;  %s1126_s14 = sphi %s1173_s14, %s1452_s14   ;;  %s1122_s13 = sphi %s1171_s13, %s1451_s13   ;;  %s1118_s12 = sphi %s1169_s12, %s1450_s12  }
   0x8   : > { %p83_p0 = scmp.ne.s32.totalorder %s1126_s14, %s1122_s13  ;;  %p84_p1 = scmp.eq.s32.totalorder %s1138_s17, 0 }
   0x9   : > { %p89_p2 = scmp.ne.s32.totalorder %s1122_s13, %s1118_s12  ;;  %p1206_p3 = scmp.eq.s32.totalorder %s765_s18, 0 }
   0xa   : > { %p1210_p4 = por %p84_p1, %p83_p0  ;;  %p141_p5 = scmp.eq.s32.totalorder %s765_s18, 2 }
   0xb   : > { %s1435_s20 = scalar_select %p1206_p3, 1, 0 }
   0xc   : > { %p1216_p6 = por %p1206_p3, %p89_p2  ;;  %p147_p7 = scmp.eq.s32.totalorder %s766_s19, 2 }
   0xd   : > { %p1220_p8 = por %p141_p5, %p83_p0  ;;  %p767_p9 = scmp.ge.s32.totalorder %s1138_s17, 1 }
   0xe   : > { %s1437_s22 = scalar_select %p1216_p6, 1, 0 }
   0xf   : > { %s1438_s23 = scalar_select %p1220_p8, 1, 0 }
  0x10   : > { %p1225_p10 = por %p147_p7, %p89_p2  ;;  %p154_p11 = scmp.lt.s32.totalorder %s1138_s17, 4 }
  0x11   : > { %s1140_s26 = smov [#allocation3]   ;;  %p882_p0 = scmp.lt.s32.totalorder %s1138_s17, 3 }
  0x12   : > { %s1439_s24 = scalar_select %p1225_p10, 1, 0 }
  0x13   : > { %p1230_p12 = pnand %p767_p9, %p154_p11  ;;  %s172_s27 = sshll.u32 %s1140_s26, 4  ;;  %s173_s27 = int_to_ptr.vmem [resolvable:$true] %s172_s27 }
  0x14   : > { %p1245_p2 = pnand %p882_p0, %p1210_p4  ;;  %s35_s30 = sadd.s32 1, %s1134_s16 }
  0x15   : > { %s1440_s25 = scalar_select %p1230_p12, 1, 0 }
  0x16   : > { %p869_p13 = pneg %p1230_p12  ;;  %s994_s6 = scalar_lea.hbm %s1424_s0, 512 }
  0x17   : > { %s1442_s29 = scalar_select %p1245_p2, 1, 0 }
  0x18   : > { %p1239_p1 = pnand %p869_p13, %p1206_p3  ;;  %p995_p5 = scmp.ne.s32.totalorder %s1424_s0, %s994_s6 }
  0x19   : > { %p1001_p4 = scmp.lt.u32.totalorder %s994_s6, %s1424_s0 }
  0x1a   : > { %p996_p7 = pneg %p1239_p1 }
  0x1c   : > { %p997_p9 = pnand %p996_p7, %p995_p5 }
  0x1e   : > { %p998_p11 = pneg %p997_p9 }
  0x20   : > { %p1003_p13 = pnand %p1001_p4, %p998_p11 }
  0x22   : > { %1006 = shalt.err (!%p1003_p13)
}
  0x23   : > { %s1007_s11 = scalar_lea.vmem %s173_s27, 512  ;;  %p1015_p6 = scmp.lt.s32.totalorder %s173_s27, %s173_s27 }
  0x24   : > { %p1008_p0 = scmp.ne.s32.totalorder %s173_s27, %s1007_s11  ;;  %p1016_p3 = scmp.lt.s32.totalorder %s1007_s11, %s1007_s11 }
  0x26   : > { %p1010_p10 = pnand %p1008_p0, %p996_p7  ;;  %p1017_p12 = por %p1016_p3, %p1015_p6 }
  0x28   : > { %p1011_p8 = pneg %p1010_p10 }
  0x2a   : > { %p1018_p2 = pnand %p1017_p12, %p1011_p8 }
  0x2c   : > { %1021 = shalt.err (!%p1018_p2)
}
  0x2d   : > { %s1434_s18 = smov 128   ;;  %s1142_s19 = smov 8  }
  0x2e   : > { %872 = dma.hbm_to_vmem [thread:$0]  (!%p1239_p1), %s1424_s0, 512, %s173_s27, [#allocation4], %s1434_s18, %s1434_s18, %s1142_s19  }
  0x2f   : > { %p37_p10 = scmp.ge.s32.totalorder %s35_s30, 3  ;;  %s76_s4 = sadd.s32 1, %s1126_s14 }
  0x30   : > { %s186_s5 = sand.u32 1, %s1126_s14   ;;  %s823_s8 = sshll.u32 %s1134_s16, 7 }
  0x31   : > { %s1456_s30 = smov (%p37_p10, %s35_s30), 0  ;;  %s770_s6 = sshll.u32 %s186_s5, 8 }
  0x32   : > { %s72_s7 = ssub.s32 %s1134_s16, %s1456_s30  ;;  %s1279_s10 = scalar_lea.hbm %s1425_s1, %s823_s8 }
  0x33   : > { %p74_p3 = scmp.eq.s32.totalorder %s72_s7, 0  ;;  %s190_s27 = scalar_lea.vmem [#allocation6], %s770_s6 }
  0x34   : > { %s200_s11 = sshll.u32 %s190_s27, 4  ;;  %s1286_s26 = scalar_lea.sflag [#allocation7], %s186_s5  ;;  %s1284_s11 = int_to_ptr.vmem [resolvable:$true] %s200_s11 }
  0x35   : > { %s1282_s21 = scalar_select %p74_p3, %s1126_s14, %s76_s4  }
  0x36   : > { %s1022_s18 = scalar_lea.hbm %s1279_s10, 4096  ;;  %p1443_p8 = scmp.ne.s32.totalorder %s1442_s29, 0 }
  0x37   : > { %p1023_p6 = scmp.ne.s32.totalorder %s1279_s10, %s1022_s18  ;;  %s1027_s28 = scalar_lea.hbm %s1425_s1, 12288 }
  0x38   : > { %p1024_p12 = pneg %p1443_p8  ;;  %p1028_p5 = scmp.lt.u32.totalorder %s1279_s10, %s1425_s1 }
  0x39   : > { %p1029_p7 = scmp.lt.u32.totalorder %s1027_s28, %s1022_s18  ;;  %p1031_p11 = scmp.lt.u32.totalorder %s1022_s18, %s1279_s10 }
  0x3a   : > { %p1025_p1 = pnand %p1024_p12, %p1023_p6 }
  0x3b   : > { %p1030_p9 = por %p1029_p7, %p1028_p5 }
  0x3c   : > { %p1026_p2 = pneg %p1025_p1 }
  0x3d   : > { %p1032_p4 = por %p1031_p11, %p1030_p9 }
  0x3f   : > { %p1033_p13 = pnand %p1032_p4, %p1026_p2 }
  0x41   : > { %1036 = shalt.err (!%p1033_p13)
}
  0x42   : > { %s1037_s4 = scalar_lea.vmem %s1284_s11, 4096  ;;  %s1143_s5 = smov [#allocation6]  }
  0x43   : > { %p1038_p0 = scmp.ne.s32.totalorder %s1284_s11, %s1037_s4  ;;  %s1042_s27 = sshll.u32 %s1143_s5, 4  ;;  %s1043_s27 = int_to_ptr.vmem [resolvable:$false] %s1042_s27 }
  0x44   : > { %s1044_s7 = scalar_lea.vmem %s1043_s27, 8192  ;;  %p1045_p6 = scmp.lt.s32.totalorder %s1284_s11, %s1043_s27 }
  0x45   : > { %p1040_p10 = pnand %p1038_p0, %p1024_p12  ;;  %p1046_p1 = scmp.lt.s32.totalorder %s1044_s7, %s1037_s4 }
  0x47   : > { %p1041_p3 = pneg %p1040_p10  ;;  %p1047_p5 = por %p1046_p1, %p1045_p6 }
  0x49   : > { %p1048_p7 = pnand %p1047_p5, %p1041_p3 }
  0x4b   : > { %1051 = shalt.err (!%p1048_p7)
}
  0x4c   : > { %s1144_s18 = smov 384   ;;  %s1444_s8 = smov 128  }
  0x4d   : > { %876 = dma.hbm_to_vmem [thread:$0]  (!%p1443_p8), %s1279_s10, 4096, %s1284_s11, %s1286_s26, %s1144_s18, %s1444_s8, %s1142_s19  }
  0x4e   : > { %p1445_p12 = scmp.ne.s32.totalorder %s1440_s25, 0 }
  0x4f   : > { %p1446_p2 = scmp.ne.s32.totalorder (!%p1445_p12), %s1435_s20, 0 }
  0x50   : > { %220 = sbr.rel (%p1445_p12) target bundleno = 392 (0x188), region = 32 }
  0x57   : > { %1105 = dma.done.wait (%p1446_p2), [#allocation4], 512  }
  0x58   : > { %1107 = vsyncadd (%p1446_p2), [#allocation4], 4294966784  ;;  %s1323_s28 = sand.u32 1, %s1122_s13   ;;  %p1447_p8 = scmp.ne.s32.totalorder %s1437_s22, 0 }
  0x59   : > { %s775_s29 = sshll.u32 %s1323_s28, 8  ;;  %s227_s6 = scalar_lea.sflag [#allocation7], %s1323_s28 }
  0x5a   : > { %s1327_s9 = scalar_lea.vmem [#allocation6], %s775_s29 }
  0x5b   : > { %1109 = dma.done.wait (%p1447_p8), %s227_s6, 4096  }
  0x5c   : > { %1111 = vsyncadd (%p1447_p8), %s227_s6, 4294963200  ;;  %v940_v0 = vld [vmem:[%s1327_s9 + $0x4] ss:$8 sps:$4 sm:$0xff]   ;;  %v942_v1 = vld [vmem:[%s1327_s9] ss:$8 sps:$4 sm:$0xff]   ;;  %s777_s20 = sshll.u32 %s1130_s15, 1  ;;  %v586_v36 = vlaneseq }
  0x5d   : > { %504 = vmatprep.subr.bf16.mxu0 %v940_v0  ;;  %829 = vmatprep.subr.bf16.mxu1 %v940_v0  ;;  %v943_v2 = vld [vmem:[%s1327_s9 + $0x14] ss:$8 sps:$4 sm:$0xff]   ;;  %v945_v3 = vld [vmem:[%s1327_s9 + $0x10] ss:$8 sps:$4 sm:$0xff]   ;;  %v946_v4 = vld [vmem:[%s1327_s9 + $0x24] ss:$8 sps:$4 sm:$0xff]  }
  0x5e   : > { %505 = vmatpush1.bf16.msra.mxu0 %v942_v1  ;;  %845 = vmatpush1.bf16.msra.mxu1 %v942_v1  ;;  %v948_v5 = vld [vmem:[%s1327_s9 + $0x20] ss:$8 sps:$4 sm:$0xff]   ;;  %v949_v6 = vld [vmem:[%s1327_s9 + $0x34] ss:$8 sps:$4 sm:$0xff]   ;;  %v951_v7 = vld [vmem:[%s1327_s9 + $0x30] ss:$8 sps:$4 sm:$0xff]  }
  0x5f   : > { %506 = vmatprep.subr.bf16.mxu0 %v943_v2  ;;  %830 = vmatprep.subr.bf16.mxu1 %v943_v2  ;;  %v952_v8 = vld [vmem:[%s1327_s9 + $0x44] ss:$8 sps:$4 sm:$0xff]   ;;  %v954_v9 = vld [vmem:[%s1327_s9 + $0x40] ss:$8 sps:$4 sm:$0xff]   ;;  %v955_v10 = vld [vmem:[%s1327_s9 + $0x54] ss:$8 sps:$4 sm:$0xff]  }
  0x60   : > { %v957_v11 = vld [vmem:[%s1327_s9 + $0x50] ss:$8 sps:$4 sm:$0xff]   ;;  %v958_v12 = vld [vmem:[%s1327_s9 + $0x64] ss:$8 sps:$4 sm:$0xff]   ;;  %v960_v14 = vld [vmem:[%s1327_s9 + $0x60] ss:$8 sps:$4 sm:$0xff]  }
  0x61   : > { %v990_v13 = vld [vmem:[#allocation3 + $0x4] ss:$8 sps:$4 sm:$0xff]   ;;  %v993_v15 = vld [vmem:[#allocation3 + $0x14] ss:$8 sps:$4 sm:$0xff]   ;;  %v963_v17 = vld [vmem:[%s1327_s9 + $0x70] ss:$8 sps:$4 sm:$0xff]  }
  0x62   : > { %507 = vmatpush1.bf16.msra.mxu0 %v945_v3  ;;  %846 = vmatpush1.bf16.msra.mxu1 %v945_v3  ;;  %v961_v16 = vld [vmem:[%s1327_s9 + $0x74] ss:$8 sps:$4 sm:$0xff]   ;;  %v964_v18 = vld [vmem:[%s1327_s9 + $0x84] ss:$8 sps:$4 sm:$0xff]   ;;  %v966_v19 = vld [vmem:[%s1327_s9 + $0x80] ss:$8 sps:$4 sm:$0xff]  }
  0x63   : > { %508 = vmatprep.subr.bf16.mxu0 %v946_v4  ;;  %831 = vmatprep.subr.bf16.mxu1 %v946_v4  ;;  %v967_v20 = vld [vmem:[%s1327_s9 + $0x94] ss:$8 sps:$4 sm:$0xff]   ;;  %v969_v21 = vld [vmem:[%s1327_s9 + $0x90] ss:$8 sps:$4 sm:$0xff]   ;;  %v970_v22 = vld [vmem:[%s1327_s9 + $0xa4] ss:$8 sps:$4 sm:$0xff]  }
  0x64   : > { %536 = vmatprep.mubr.bf16.mxu0 %v990_v13  ;;  %546 = vmatprep.mubr.bf16.mxu1 %v993_v15  ;;  %v972_v23 = vld [vmem:[%s1327_s9 + $0xa0] ss:$8 sps:$4 sm:$0xff]   ;;  %v973_v24 = vld [vmem:[%s1327_s9 + $0xb4] ss:$8 sps:$4 sm:$0xff]   ;;  %v975_v25 = vld [vmem:[%s1327_s9 + $0xb0] ss:$8 sps:$4 sm:$0xff]  }
  0x65   : > { %v976_v26 = vld [vmem:[%s1327_s9 + $0xc4] ss:$8 sps:$4 sm:$0xff]   ;;  %v978_v27 = vld [vmem:[%s1327_s9 + $0xc0] ss:$8 sps:$4 sm:$0xff]   ;;  %v979_v28 = vld [vmem:[%s1327_s9 + $0xd4] ss:$8 sps:$4 sm:$0xff]  }
  0x66   : > { %509 = vmatpush1.bf16.msra.mxu0 %v948_v5  ;;  %847 = vmatpush1.bf16.msra.mxu1 %v948_v5  ;;  %v981_v29 = vld [vmem:[%s1327_s9 + $0xd0] ss:$8 sps:$4 sm:$0xff]   ;;  %v982_v30 = vld [vmem:[%s1327_s9 + $0xe4] ss:$8 sps:$4 sm:$0xff]   ;;  %v984_v31 = vld [vmem:[%s1327_s9 + $0xe0] ss:$8 sps:$4 sm:$0xff]  }
  0x67   : > { %510 = vmatprep.subr.bf16.mxu0 %v949_v6  ;;  %832 = vmatprep.subr.bf16.mxu1 %v949_v6  ;;  %v985_v32 = vld [vmem:[%s1327_s9 + $0xf4] ss:$8 sps:$4 sm:$0xff]   ;;  %v987_v33 = vld [vmem:[%s1327_s9 + $0xf0] ss:$8 sps:$4 sm:$0xff]   ;;  %v988_v34 = vld [vmem:[#allocation3] ss:$8 sps:$4 sm:$0xff]  }
  0x68   : > { %v991_v35 = vld [vmem:[#allocation3 + $0x10] ss:$8 sps:$4 sm:$0xff]   ;;  %p262_p9 = scmp.lt.s32.totalorder %s777_s20, 5  ;;  %v587_v37 = vshrl.u32 %v586_v36, 7  ;;  %s776_s10 = sshll.u32 %s1323_s28, 5 }
  0x69   : > { %s256_s11 = scalar_lea.vmem [#allocation8], %s776_s10  ;;  %s828_s4 = sshll.u32 %s1130_s15, 7 }
  0x6a   : > { %511 = vmatpush1.bf16.msra.mxu0 %v951_v7  ;;  %848 = vmatpush1.bf16.msra.mxu1 %v951_v7  ;;  %s1458_s20 = smov (!%p262_p9, %s777_s20), 5  ;;  %v588_v38 = vsub.s32 0, %v587_v37  ;;  %v592_v40 = vsub.s32 1, %v587_v37  ;;  %s649_s26 = sshll.u32 %s256_s11, 4  ;;  %s1371_s26 = int_to_ptr.vmem [resolvable:$true] %s649_s26 }
  0x6b   : > { %512 = vmatprep.subr.bf16.mxu0 %v952_v8  ;;  %833 = vmatprep.subr.bf16.mxu1 %v952_v8  ;;  %s264_s19 = scalar_lea.vmem %s1426_s2, %s1458_s20  ;;  %s1376_s7 = scalar_lea.hbm %s1427_s3, %s828_s4 }
  0x6c   : > { %v584_v39 = vld [vmem:[%s264_s19] sm:$0x3]  ;;  %s633_s15 = scalar_lea.sflag [#allocation5], %s1323_s28  ;;  %s1052_s18 = scalar_lea.vmem %s1371_s26, 512 }
  0x6d   : > { %v589_v41 = vrot.slane %v584_v39, %v588_v38  ;;  %v593_v42 = vrot.slane %v584_v39, %v592_v40  ;;  %p1053_p11 = scmp.ne.s32.totalorder %s1371_s26, %s1052_s18  ;;  %p1448_p4 = scmp.ne.s32.totalorder %s1438_s23, 0 }
  0x6e   : > { %513 = vmatpush1.bf16.msra.mxu0 %v954_v9  ;;  %849 = vmatpush1.bf16.msra.mxu1 %v954_v9  ;;  %s1145_s8 = smov [#allocation8]  }
  0x6f   : > { %514 = vmatprep.subr.bf16.mxu0 %v955_v10  ;;  %834 = vmatprep.subr.bf16.mxu1 %v955_v10  ;;  %p1054_p13 = pnand %p1053_p11, %p1448_p4  ;;  %s1056_s29 = sshll.u32 %s1145_s8, 4  ;;  %s1057_s29 = int_to_ptr.vmem [resolvable:$false] %s1056_s29 }
  0x70   : > { %s1058_s6 = scalar_lea.vmem %s1057_s29, 1024  ;;  %p1059_p10 = scmp.lt.s32.totalorder %s1371_s26, %s1057_s29 }
  0x71   : > { %p1055_p0 = pneg %p1054_p13  ;;  %p1060_p3 = scmp.lt.s32.totalorder %s1058_s6, %s1052_s18 }
  0x72   : > { %515 = vmatpush1.bf16.msra.mxu0 %v957_v11  ;;  %850 = vmatpush1.bf16.msra.mxu1 %v957_v11 }
  0x73   : > { %516 = vmatprep.subr.bf16.mxu0 %v958_v12  ;;  %835 = vmatprep.subr.bf16.mxu1 %v958_v12  ;;  %p1061_p6 = por %p1060_p3, %p1059_p10 }
  0x75   : > { %p1062_p1 = pnand %p1061_p6, %p1055_p0 }
  0x76   : > { %517 = vmatpush1.bf16.msra.mxu0 %v960_v14  ;;  %851 = vmatpush1.bf16.msra.mxu1 %v960_v14 }
  0x77   : > { %518 = vmatprep.subr.bf16.mxu0 %v961_v16  ;;  %836 = vmatprep.subr.bf16.mxu1 %v961_v16 }
  0x7a   : > { %519 = vmatpush1.bf16.msra.mxu0 %v963_v17  ;;  %852 = vmatpush1.bf16.msra.mxu1 %v963_v17 }
  0x7b   : > { %520 = vmatprep.subr.bf16.mxu0 %v964_v18  ;;  %837 = vmatprep.subr.bf16.mxu1 %v964_v18 }
  0x7e   : > { %521 = vmatpush1.bf16.msra.mxu0 %v966_v19  ;;  %853 = vmatpush1.bf16.msra.mxu1 %v966_v19 }
  0x7f   : > { %522 = vmatprep.subr.bf16.mxu0 %v967_v20  ;;  %838 = vmatprep.subr.bf16.mxu1 %v967_v20 }
  0x82   : > { %523 = vmatpush1.bf16.msra.mxu0 %v969_v21  ;;  %854 = vmatpush1.bf16.msra.mxu1 %v969_v21 }
  0x83   : > { %524 = vmatprep.subr.bf16.mxu0 %v970_v22  ;;  %839 = vmatprep.subr.bf16.mxu1 %v970_v22 }
  0x86   : > { %525 = vmatpush1.bf16.msra.mxu0 %v972_v23  ;;  %855 = vmatpush1.bf16.msra.mxu1 %v972_v23 }
  0x87   : > { %526 = vmatprep.subr.bf16.mxu0 %v973_v24  ;;  %840 = vmatprep.subr.bf16.mxu1 %v973_v24 }
  0x8a   : > { %527 = vmatpush1.bf16.msra.mxu0 %v975_v25  ;;  %856 = vmatpush1.bf16.msra.mxu1 %v975_v25 }
  0x8b   : > { %528 = vmatprep.subr.bf16.mxu0 %v976_v26  ;;  %841 = vmatprep.subr.bf16.mxu1 %v976_v26 }
  0x8e   : > { %529 = vmatpush1.bf16.msra.mxu0 %v978_v27  ;;  %857 = vmatpush1.bf16.msra.mxu1 %v978_v27 }
  0x8f   : > { %530 = vmatprep.subr.bf16.mxu0 %v979_v28  ;;  %842 = vmatprep.subr.bf16.mxu1 %v979_v28 }
  0x92   : > { %531 = vmatpush1.bf16.msra.mxu0 %v981_v29  ;;  %858 = vmatpush1.bf16.msra.mxu1 %v981_v29 }
  0x93   : > { %532 = vmatprep.subr.bf16.mxu0 %v982_v30  ;;  %843 = vmatprep.subr.bf16.mxu1 %v982_v30 }
  0x96   : > { %533 = vmatpush1.bf16.msra.mxu0 %v984_v31  ;;  %859 = vmatpush1.bf16.msra.mxu1 %v984_v31 }
  0x97   : > { %534 = vmatprep.subr.bf16.mxu0 %v985_v32  ;;  %844 = vmatprep.subr.bf16.mxu1 %v985_v32 }
  0x9a   : > { %535 = vmatpush1.bf16.msra.mxu0 %v987_v33  ;;  %860 = vmatpush1.bf16.msra.mxu1 %v987_v33 }
  0x9d   : > { %537 = vmatmul.mubr.bf16.vlgmr.msra.gmra.mrb[0].mxu0 %v988_v34  ;;  %547 = vmatmul.mubr.bf16.vlgmr.msra.gmra.mrb[0].mxu1 %v991_v35 }
 0x170   : > { %v538_v43 = vpop.f32.mrb[0].mxu0  ;;  %v548_v44 = vpop.f32.mrb[0].mxu1 }
 0x171   : > { %v596_v45 = vadd.f32 %v589_v41, %v538_v43  ;;  %v600_v46 = vadd.f32 %v589_v41, %v548_v44  ;;  %v540_v47 = vpop.f32.mrb[1].mxu0  ;;  %v550_v48 = vpop.f32.mrb[1].mxu1 }
 0x172   : > { %v597_v49 = vadd.f32 %v593_v42, %v540_v47  ;;  %v601_v50 = vadd.f32 %v593_v42, %v550_v48  ;;  %v542_v51 = vpop.f32.mrb[2].mxu0  ;;  %v552_v52 = vpop.f32.mrb[2].mxu1 }
 0x173   : > { %v598_v53 = vadd.f32 %v589_v41, %v542_v51  ;;  %v602_v54 = vadd.f32 %v589_v41, %v552_v52  ;;  %v544_v55 = vpop.f32.mrb[3].mxu0  ;;  %v554_v56 = vpop.f32.mrb[3].mxu1 }
 0x174   : > { %v824_v57 = vpack.c.bf16 %v597_v49, %v596_v45  ;;  %v826_v58 = vpack.c.bf16 %v601_v50, %v600_v46  ;;  %v599_v59 = vadd.f32 %v593_v42, %v544_v55  ;;  %v603_v60 = vadd.f32 %v593_v42, %v554_v56 }
 0x176   : > { %628 = vst [vmem:[%s256_s11] sm:$0xff] %v824_v57  ;;  %630 = vst [vmem:[%s256_s11 + $0x10] sm:$0xff] %v826_v58  ;;  %v825_v61 = vpack.c.bf16 %v599_v59, %v598_v53  ;;  %v827_v62 = vpack.c.bf16 %v603_v60, %v602_v54 }
 0x178   : > { %629 = vst [vmem:[%s256_s11 + $0x8] sm:$0xff] %v825_v61  ;;  %631 = vst [vmem:[%s256_s11 + $0x18] sm:$0xff] %v827_v62 }
 0x179   : > { %1065 = shalt.err (!%p1062_p1)
}
 0x17a   : > { %s1066_s9 = scalar_lea.hbm %s1376_s7, 512  ;;  %s1070_s25 = scalar_lea.hbm %s1427_s3, 1536 }
 0x17b   : > { %p1067_p5 = scmp.ne.s32.totalorder %s1376_s7, %s1066_s9  ;;  %p1071_p2 = scmp.lt.u32.totalorder %s1376_s7, %s1427_s3 }
 0x17c   : > { %p1072_p8 = scmp.lt.u32.totalorder %s1070_s25, %s1066_s9  ;;  %p1074_p11 = scmp.lt.u32.totalorder %s1066_s9, %s1376_s7 }
 0x17d   : > { %p1068_p7 = pnand %p1067_p5, %p1448_p4 }
 0x17e   : > { %p1073_p9 = por %p1072_p8, %p1071_p2 }
 0x17f   : > { %p1069_p12 = pneg %p1068_p7 }
 0x180   : > { %p1075_p13 = por %p1074_p11, %p1073_p9 }
 0x182   : > { %p1076_p0 = pnand %p1075_p13, %p1069_p12 }
 0x184   : > { %1079 = shalt.err (!%p1076_p0)
}
 0x185   : > { %s1146_s11 = smov 128   ;;  %s1147_s4 = smov 384  }
 0x186   : > { %s1148_s5 = smov 8  }
 0x187   : > { %867 = dma.vmem_to_hbm [thread:$0]  (%p1448_p4), %s1371_s26, 512, %s1376_s7, %s633_s15, %s1146_s11, %s1147_s4, %s1148_s5  }
 0x188 PF: > { %p884_p10 = scmp.ge.s32.totalorder %s1138_s17, 2  ;;  %s664_s27 = sand.u32 1, %s1118_s12  }
 0x189   : > { %p1449_p3 = scmp.ne.s32.totalorder %s1439_s24, 0  ;;  %s665_s18 = scalar_lea.sflag [#allocation5], %s664_s27 }
 0x18b   : > { %p878_p6 = pnand %p884_p10, %p1449_p3 }
 0x18d   : > { %1113 = dma.done.wait (!%p878_p6), %s665_s18, 512  }
 0x18e   : > { %1115 = vsyncadd (!%p878_p6), %s665_s18, 4294966784  ;;  %s20_s17 = sadd.s32 1, %s1138_s17   ;;  %s1450_s12 = smov %s1122_s13 }
 0x18f   : > { %p17_p1 = scmp.ge.s32.totalorder %s20_s17, 5   ;;  %s1451_s13 = smov %s1126_s14 }
 0x190   : > { %s1452_s14 = smov %s1282_s21  ;;  %s1453_s15 = smov %s1134_s16 }
 0x191   : > { %s1454_s16 = smov %s1456_s30  ;;  %19 = sbr.rel (!%p17_p1) target bundleno = 7 (0x7), region = 94 }
 0x198   :  { %670 = vsyncpa [#allocation4], 1 }
 0x199   :  { %672 = vsyncpa [#allocation4 + $0x1], 1 }
 0x19a   :  { %673 = vsyncpa [#allocation7], 1 }
 0x19b   :  { %675 = vsyncpa [#allocation7 + $0x1], 1 }
 0x19c   :  { %676 = vsyncpa [#allocation5], 1 }
 0x19d   :  { %678 = vsyncpa [#allocation5 + $0x1], 1 }

</bundles_post_ra>
